<compile_context>
chip_gen: v7x
topology: tpu7x:2x2x1
jax: 0.10.0
libtpu: 0.0.40
codegen_flags: <defaults>
</compile_context>

<pallas_src>
import math
from functools import partial

import jax
import jax.numpy as jnp
from jax import lax
from jax.experimental import pallas as pl
from jax.experimental.pallas import tpu as pltpu


def _round_up(x, m):
    return ((x + m - 1) // m) * m


def _vmem_limit_bytes(t_block, b_pad, h_pad, ndir):
    """Derive a VMEM budget from the actual tile sizes (double-buffered)."""
    f32, bf16 = 4, 2
    act = ndir * 2 * 2 * t_block * b_pad * h_pad * f32   # P-in + out, 2 bufs
    wgt = ndir * 2 * h_pad * h_pad * bf16                 # Whh^T, 2 bufs
    h0 = 2 * b_pad * h_pad * f32
    scratch = ndir * b_pad * h_pad * f32
    need = act + wgt + h0 + scratch
    return int(min(128 * 2 ** 20, max(16 * 2 ** 20, 2 * need + (2 << 20))))


# ----------------------------------------------------------------------------
# Pallas kernels: pure recurrence (P precomputed outside).
# grid = (T_pad // t_block,), hidden state carried in f32 VMEM scratch.
# ----------------------------------------------------------------------------
def _uni_recurrence_kernel(p_ref, whh_ref, h0_ref, out_ref, h_state,
                           *, t_block, t_real):
    blk = pl.program_id(0)

    @pl.when(blk == 0)
    def _():
        h_state[...] = h0_ref[...]

    whh = whh_ref[...]                       # (H_pad, H_pad) bf16, resident
    start = blk * t_block

    def body(i, h):
        g_t = start + i
        pre = jnp.dot(h.astype(whh.dtype), whh,
                      preferred_element_type=jnp.float32) + p_ref[i]
        # Mask padded tail steps (g_t >= T): keep h unchanged.
        h_new = jnp.where(g_t < t_real, jnp.tanh(pre), h)
        out_ref[i] = h_new.astype(out_ref.dtype)
        return h_new

    h_state[...] = lax.fori_loop(0, t_block, body, h_state[...], unroll=True)


def _bidir_recurrence_kernel(p_f_ref, p_b_ref, whh_f_ref, whh_b_ref, h0_ref,
                             out_f_ref, out_b_ref, h_state,
                             *, t_block, t_real):
    blk = pl.program_id(0)
    nblk = pl.num_programs(0)

    @pl.when(blk == 0)
    def _():
        h_state[0] = h0_ref[...]
        h_state[1] = h0_ref[...]

    whh_f = whh_f_ref[...]
    whh_b = whh_b_ref[...]
    start_f = blk * t_block
    start_b = (nblk - 1 - blk) * t_block

    def body(i, carry):
        h_f, h_b = carry
        # ---- forward direction: global step start_f + i -------------------
        g_f = start_f + i
        pre_f = jnp.dot(h_f.astype(whh_f.dtype), whh_f,
                        preferred_element_type=jnp.float32) + p_f_ref[i]
        h_f_new = jnp.where(g_f < t_real, jnp.tanh(pre_f), h_f)
        out_f_ref[i] = h_f_new.astype(out_f_ref.dtype)
        # ---- backward direction: reverse intra-block order -----------------
        j = t_block - 1 - i
        g_b = start_b + j
        pre_b = jnp.dot(h_b.astype(whh_b.dtype), whh_b,
                        preferred_element_type=jnp.float32) + p_b_ref[j]
        # Mask padded tail steps so the reverse recurrence starts from h0 at
        # the true last step.
        h_b_new = jnp.where(g_b < t_real, jnp.tanh(pre_b), h_b)
        out_b_ref[j] = h_b_new.astype(out_b_ref.dtype)
        return h_f_new, h_b_new

    h_f, h_b = lax.fori_loop(0, t_block, body, (h_state[0], h_state[1]),
                             unroll=True)
    h_state[0] = h_f
    h_state[1] = h_b


# ----------------------------------------------------------------------------
# pallas_call wrappers
# ----------------------------------------------------------------------------
def _run_recurrence_uni(p, whh_t, h0_pad, t_real, t_block):
    t_pad, b_pad, h_pad = p.shape
    nblk = t_pad // t_block
    kernel = partial(_uni_recurrence_kernel, t_block=t_block, t_real=t_real)
    blk_map = lambda b: (b, 0, 0)
    return pl.pallas_call(
        kernel,
        out_shape=jax.ShapeDtypeStruct((t_pad, b_pad, h_pad), jnp.float32),
        grid_spec=pltpu.PrefetchScalarGridSpec(
            num_scalar_prefetch=0,
            grid=(nblk,),
            in_specs=[
                pl.BlockSpec((t_block, b_pad, h_pad), blk_map),     # P block
                pl.BlockSpec((h_pad, h_pad), lambda b: (0, 0)),     # Whh^T bf16
                pl.BlockSpec((b_pad, h_pad), lambda b: (0, 0)),     # h0
            ],
            out_specs=pl.BlockSpec((t_block, b_pad, h_pad), blk_map),
            scratch_shapes=[pltpu.VMEM((b_pad, h_pad), jnp.float32)],
        ),
        compiler_params=pltpu.CompilerParams(
            dimension_semantics=("arbitrary",),   # sequential recurrence
            vmem_limit_bytes=_vmem_limit_bytes(t_block, b_pad, h_pad, 1),
        ),
    )(p, whh_t, h0_pad)


def _run_recurrence_bidir(p_f, p_b, whh_f_t, whh_b_t, h0_pad, t_real, t_block):
    t_pad, b_pad, h_pad = p_f.shape
    nblk = t_pad // t_block
    kernel = partial(_bidir_recurrence_kernel, t_block=t_block, t_real=t_real)
    fwd_map = lambda b: (b, 0, 0)
    bwd_map = lambda b: (nblk - 1 - b, 0, 0)
    out_f, out_b = pl.pallas_call(
        kernel,
        out_shape=(jax.ShapeDtypeStruct((t_pad, b_pad, h_pad), jnp.float32),
                   jax.ShapeDtypeStruct((t_pad, b_pad, h_pad), jnp.float32)),
        grid_spec=pltpu.PrefetchScalarGridSpec(
            num_scalar_prefetch=0,
            grid=(nblk,),
            in_specs=[
                pl.BlockSpec((t_block, b_pad, h_pad), fwd_map),      # P fwd
                pl.BlockSpec((t_block, b_pad, h_pad), bwd_map),      # P bwd
                pl.BlockSpec((h_pad, h_pad), lambda b: (0, 0)),      # Whh^T fwd
                pl.BlockSpec((h_pad, h_pad), lambda b: (0, 0)),      # Whh^T bwd
                pl.BlockSpec((b_pad, h_pad), lambda b: (0, 0)),      # h0
            ],
            out_specs=[pl.BlockSpec((t_block, b_pad, h_pad), fwd_map),
                       pl.BlockSpec((t_block, b_pad, h_pad), bwd_map)],
            scratch_shapes=[pltpu.VMEM((2, b_pad, h_pad), jnp.float32)],
        ),
        compiler_params=pltpu.CompilerParams(
            dimension_semantics=("arbitrary",),
            vmem_limit_bytes=_vmem_limit_bytes(t_block, b_pad, h_pad, 2),
        ),
    )(p_f, p_b, whh_f_t, whh_b_t, h0_pad)
    return out_f, out_b


# ----------------------------------------------------------------------------
# Off-critical-path input projection (plain XLA GEMM, f32, padded layout).
# ----------------------------------------------------------------------------
def _project_inputs(slabs, feat_sizes, w_ih, bias_sum, hidden_size, h_pad):
    """P = sum_k slabs[k] @ Wih_k^T + (b_ih + b_hh), in padded layout."""
    t_pad, b_pad, _ = slabs[0].shape
    p = jnp.zeros((t_pad, b_pad, h_pad), jnp.float32)
    off = 0
    for slab, f in zip(slabs, feat_sizes):
        f_pad = slab.shape[-1]
        w_part = jnp.asarray(w_ih)[:, off:off + f]                    # (H, f)
        w_t = jnp.zeros((f_pad, h_pad), jnp.float32).at[:f, :hidden_size].set(
            w_part.T.astype(jnp.float32))
        p = p + jnp.einsum('tbf,fh->tbh', slab, w_t,
                           preferred_element_type=jnp.float32)
        off += f
    bias = jnp.zeros((h_pad,), jnp.float32).at[:hidden_size].set(
        jnp.asarray(bias_sum, jnp.float32))
    return p + bias


# ----------------------------------------------------------------------------
# Module-level wrapper mirroring the PyTorch RNN forward (tanh, bias=True).
# ----------------------------------------------------------------------------
def make_rnn_params(key, input_size, hidden_size, num_layers=1,
                    bidirectional=False, dtype=jnp.float32):
    """Deterministic init matching reset_parameters: U(-1/sqrt(H), 1/sqrt(H))."""
    stdv = 1.0 / math.sqrt(hidden_size) if hidden_size > 0 else 0.0
    num_directions = 2 if bidirectional else 1
    params = []
    for layer in range(num_layers):
        layer_dirs = []
        for _ in range(num_directions):
            layer_input_size = (input_size if layer == 0
                                else hidden_size * num_directions)
            key, k1, k2, k3, k4 = jax.random.split(key, 5)
            w_ih = jax.random.uniform(k1, (hidden_size, layer_input_size),
                                      dtype, -stdv, stdv)
            w_hh = jax.random.uniform(k2, (hidden_size, hidden_size),
                                      dtype, -stdv, stdv)
            b_ih = jax.random.uniform(k3, (hidden_size,), dtype, -stdv, stdv)
            b_hh = jax.random.uniform(k4, (hidden_size,), dtype, -stdv, stdv)
            layer_dirs.append((w_ih, w_hh, b_ih, b_hh))
        params.append(layer_dirs)
    return params


def rnn_forward(x, params, hidden_size, *, batch_first=False,
                bidirectional=False, h_0=None, t_block=None):
    """Forward pass of the PyTorch `RNN` module (tanh nonlinearity, bias=True).

    Like the reference module, h_0 (if given) has shape (B, H) and is reused
    for every layer and both directions.  Returns only the output sequence.
    """
    if batch_first:
        x = jnp.transpose(x, (1, 0, 2))
    T, B, I = x.shape
    H = hidden_size

    if t_block is None:
        t_block = max(1, min(16, T))
    B_pad = max(8, _round_up(B, 8))
    I_pad = max(128, _round_up(I, 128))
    H_pad = max(128, _round_up(H, 128))
    T_pad = _round_up(T, t_block)

    # Pad ONCE; activations stay padded across layers, slice once at the end.
    x_pad = jnp.zeros((T_pad, B_pad, I_pad), jnp.float32).at[:T, :B, :I].set(
        x.astype(jnp.float32))
    if h_0 is None:
        h0_pad = jnp.zeros((B_pad, H_pad), jnp.float32)
    else:
        h0_pad = jnp.zeros((B_pad, H_pad), jnp.float32).at[:B, :H].set(
            h_0.astype(jnp.float32))

    slabs, feat_sizes = [x_pad], [I]
    for layer_dirs in params:
        w_ih_f, w_hh_f, b_ih_f, b_hh_f = layer_dirs[0]
        p_f = _project_inputs(slabs, feat_sizes, w_ih_f, b_ih_f + b_hh_f,
                              H, H_pad)
        whh_f_t = jnp.zeros((H_pad, H_pad), jnp.bfloat16).at[:H, :H].set(
            jnp.asarray(w_hh_f).T.astype(jnp.bfloat16))
        if bidirectional:
            w_ih_b, w_hh_b, b_ih_b, b_hh_b = layer_dirs[1]
            p_b = _project_inputs(slabs, feat_sizes, w_ih_b, b_ih_b + b_hh_b,
                                  H, H_pad)
            whh_b_t = jnp.zeros((H_pad, H_pad), jnp.bfloat16).at[:H, :H].set(
                jnp.asarray(w_hh_b).T.astype(jnp.bfloat16))
            out_f, out_b = _run_recurrence_bidir(p_f, p_b, whh_f_t, whh_b_t,
                                                 h0_pad, T, t_block)
            slabs, feat_sizes = [out_f, out_b], [H, H]
        else:
            out_f = _run_recurrence_uni(p_f, whh_f_t, h0_pad, T, t_block)
            slabs, feat_sizes = [out_f], [H]

    if bidirectional:
        output = jnp.concatenate([slabs[0][:T, :B, :H],
                                  slabs[1][:T, :B, :H]], axis=-1)
    else:
        output = slabs[0][:T, :B, :H]
    output = output.astype(x.dtype)
    if batch_first:
        output = jnp.transpose(output, (1, 0, 2))
    return output


# ----------------------------------------------------------------------------
# Pure-JAX reference (mirrors RNN.forward / rnn_cell exactly) for validation.
# ----------------------------------------------------------------------------
def rnn_reference(x, params, hidden_size, *, batch_first=False,
                  bidirectional=False, h_0=None):
    if batch_first:
        x = jnp.transpose(x, (1, 0, 2))
    T, B, _ = x.shape

    def cell(xt, h_prev, w_ih, w_hh, b_ih, b_hh):
        return jnp.tanh(xt @ w_ih.T + h_prev @ w_hh.T + b_ih + b_hh)

    inp = x
    for layer_dirs in params:
        w_ih, w_hh, b_ih, b_hh = layer_dirs[0]
        h = jnp.zeros((B, hidden_size), x.dtype) if h_0 is None else h_0
        outs_f = []
        for t in range(T):
            h = cell(inp[t], h, w_ih, w_hh, b_ih, b_hh)
            outs_f.append(h)
        out_fwd = jnp.stack(outs_f, axis=0)
        if bidirectional:
            w_ih_r, w_hh_r, b_ih_r, b_hh_r = layer_dirs[1]
            hb = jnp.zeros((B, hidden_size), x.dtype) if h_0 is None else h_0
            outs_b = [None] * T
            for t in range(T):
                hb = cell(inp[T - 1 - t], hb, w_ih_r, w_hh_r, b_ih_r, b_hh_r)
                outs_b[T - 1 - t] = hb
            out_bwd = jnp.stack(outs_b, axis=0)
            inp = jnp.concatenate([out_fwd, out_bwd], axis=2)
        else:
            inp = out_fwd
    output = inp
    if batch_first:
        output = jnp.transpose(output, (1, 0, 2))
    return output


def _check(out, ref, name):
    # Tolerance loosened vs. the f32 reference because the recurrent matmul
    # now uses bf16 MXU operands (deliberate numerics tradeoff).
    err = float(jnp.max(jnp.abs(out - ref)))
    assert out.shape == ref.shape, (name, out.shape, ref.shape)
    assert jnp.allclose(out, ref, atol=3e-2, rtol=3e-2), (name, err)


if __name__ == "__main__":
    key = jax.random.PRNGKey(0)

    # --- case 1: unidirectional, single layer (seq=8, batch=2, in=16, hid=32)
    seq_len, batch, input_size, hidden_size = 8, 2, 16, 32
    key, kx, kp = jax.random.split(key, 3)
    x = jax.random.normal(kx, (seq_len, batch, input_size), jnp.float32)
    params = make_rnn_params(kp, input_size, hidden_size,
                             num_layers=1, bidirectional=False)
    fwd1 = jax.jit(partial(rnn_forward, hidden_size=hidden_size,
                           bidirectional=False))
    out = jax.block_until_ready(fwd1(x, params))
    ref = jax.block_until_ready(
        rnn_reference(x, params, hidden_size, bidirectional=False))
    assert out.shape == (seq_len, batch, hidden_size), out.shape
    _check(out, ref, "uni_1layer")

    # --- case 2: bidirectional, 2 layers (fused fwd/bwd kernel + stacking) --
    key, kx2, kp2 = jax.random.split(key, 3)
    x2 = jax.random.normal(kx2, (seq_len, batch, input_size), jnp.float32)
    params2 = make_rnn_params(kp2, input_size, hidden_size,
                              num_layers=2, bidirectional=True)
    fwd2 = jax.jit(partial(rnn_forward, hidden_size=hidden_size,
                           bidirectional=True))
    out2 = jax.block_until_ready(fwd2(x2, params2))
    ref2 = jax.block_until_ready(
        rnn_reference(x2, params2, hidden_size, bidirectional=True))
    assert out2.shape == (seq_len, batch, 2 * hidden_size), out2.shape
    _check(out2, ref2, "bi_2layer")

    # --- case 3: ragged time blocking (T=10, t_block=4 -> padded tail) ------
    key, kx3, kp3 = jax.random.split(key, 3)
    x3 = jax.random.normal(kx3, (10, 3, input_size), jnp.float32)
    params3 = make_rnn_params(kp3, input_size, hidden_size,
                              num_layers=1, bidirectional=True)
    fwd3 = jax.jit(partial(rnn_forward, hidden_size=hidden_size,
                           bidirectional=True, t_block=4))
    out3 = jax.block_until_ready(fwd3(x3, params3))
    ref3 = jax.block_until_ready(
        rnn_reference(x3, params3, hidden_size, bidirectional=True))
    _check(out3, ref3, "bi_ragged_tblock")

    print("KERNEL_OK")
</pallas_src>

<mosaic_0001>
module attributes {stable_mosaic.version = 11 : i64} {
  func.func @_uni_recurrence_kernel(%arg0: i32, %arg1: memref<8x8x128xf32, #tpu.memory_space<vmem>>, %arg2: memref<128x128xbf16, #tpu.memory_space<vmem>>, %arg3: memref<8x128xf32, #tpu.memory_space<vmem>>, %arg4: memref<8x8x128xf32, #tpu.memory_space<vmem>>, %arg5: memref<8x128xf32, #tpu.memory_space<vmem>>) attributes {dimension_semantics = [#tpu.dimension_semantics<arbitrary>], iteration_bounds = array<i64: 1>, scalar_prefetch = 0 : i64, scratch_operands = 1 : i64, tpu.core_type = #tpu.core_type<tc>, window_params = [{transform_indices = @transform_0, window_bounds = array<i64: 8, 8, 128>}, {pipeline_mode = #tpu.pipeline_mode<synchronous>, transform_indices = @transform_1, window_bounds = array<i64: 128, 128>}, {pipeline_mode = #tpu.pipeline_mode<synchronous>, transform_indices = @transform_2, window_bounds = array<i64: 8, 128>}, {transform_indices = @transform_3, window_bounds = array<i64: 8, 8, 128>}]} {
    %c0_i32 = arith.constant 0 : i32
    %0 = arith.cmpi eq, %arg0, %c0_i32 : i32
    %1 = arith.extui %0 : i1 to i32
    %c0_i32_0 = arith.constant 0 : i32
    %2 = arith.cmpi ne, %1, %c0_i32_0 : i32
    scf.if %2 {
      %c0_55 = arith.constant 0 : index
      %c0_56 = arith.constant 0 : index
      %119 = vector.load %arg3[%c0_55, %c0_56] : memref<8x128xf32, #tpu.memory_space<vmem>>, vector<8x128xf32>
      %c0_57 = arith.constant 0 : index
      %c0_58 = arith.constant 0 : index
      %120 = vector.load %arg5[%c0_57, %c0_58] : memref<8x128xf32, #tpu.memory_space<vmem>>, vector<8x128xf32>
      tpu.vector_store %arg5[%c0_57, %c0_58], %119 {strides = array<i32>} : memref<8x128xf32, #tpu.memory_space<vmem>>, vector<8x128xf32>,
    } else {
    }
    %c0 = arith.constant 0 : index
    %c0_1 = arith.constant 0 : index
    %3 = vector.load %arg2[%c0, %c0_1] : memref<128x128xbf16, #tpu.memory_space<vmem>>, vector<128x128xbf16>
    %c8_i32 = arith.constant 8 : i32
    %4 = arith.muli %arg0, %c8_i32 : i32
    %c0_2 = arith.constant 0 : index
    %c0_3 = arith.constant 0 : index
    %5 = vector.load %arg5[%c0_2, %c0_3] : memref<8x128xf32, #tpu.memory_space<vmem>>, vector<8x128xf32>
    %c0_i32_4 = arith.constant 0 : i32
    %6 = arith.addi %4, %c0_i32_4 : i32
    %7 = arith.truncf %5 : vector<8x128xf32> to vector<8x128xbf16>
    %cst = arith.constant dense<0.000000e+00> : vector<8x128xf32>
    %8 = tpu.matmul %7, %3, %cst {dimension_numbers = #tpu.dot_dimension_numbers<[1], [0], [0], [1], [0, 0, 1, 1], [], []>} : vector<8x128xbf16>, vector<128x128xbf16>, vector<8x128xf32> -> vector<8x128xf32>
    %9 = arith.index_cast %c0_i32_4 : i32 to index
    %c0_5 = arith.constant 0 : index
    %c0_6 = arith.constant 0 : index
    %10 = vector.load %arg1[%9, %c0_5, %c0_6] : memref<8x8x128xf32, #tpu.memory_space<vmem>>, vector<1x8x128xf32>
    %11 = vector.shape_cast %10 : vector<1x8x128xf32> to vector<8x128xf32>
    %12 = arith.addf %8, %11 : vector<8x128xf32>
    %c8_i32_7 = arith.constant 8 : i32
    %13 = arith.cmpi slt, %6, %c8_i32_7 : i32
    %14 = math.tanh %12 : vector<8x128xf32>
    %15 = arith.select %13, %14, %5 : vector<8x128xf32>
    %16 = arith.index_cast %c0_i32_4 : i32 to index
    %c0_8 = arith.constant 0 : index
    %c0_9 = arith.constant 0 : index
    %17 = vector.load %arg4[%16, %c0_8, %c0_9] : memref<8x8x128xf32, #tpu.memory_space<vmem>>, vector<1x8x128xf32>
    %18 = vector.shape_cast %17 : vector<1x8x128xf32> to vector<8x128xf32>
    %19 = vector.shape_cast %15 : vector<8x128xf32> to vector<1x8x128xf32>
    tpu.vector_store %arg4[%16, %c0_8, %c0_9], %19 {strides = array<i32>} : memref<8x8x128xf32, #tpu.memory_space<vmem>>, vector<1x8x128xf32>,
    %c1_i32 = arith.constant 1 : i32
    %20 = arith.addi %4, %c1_i32 : i32
    %21 = arith.truncf %15 : vector<8x128xf32> to vector<8x128xbf16>
    %cst_10 = arith.constant dense<0.000000e+00> : vector<8x128xf32>
    %22 = tpu.matmul %21, %3, %cst_10 {dimension_numbers = #tpu.dot_dimension_numbers<[1], [0], [0], [1], [0, 0, 1, 1], [], []>} : vector<8x128xbf16>, vector<128x128xbf16>, vector<8x128xf32> -> vector<8x128xf32>
    %23 = arith.index_cast %c1_i32 : i32 to index
    %c0_11 = arith.constant 0 : index
    %c0_12 = arith.constant 0 : index
    %24 = vector.load %arg1[%23, %c0_11, %c0_12] : memref<8x8x128xf32, #tpu.memory_space<vmem>>, vector<1x8x128xf32>
    %25 = vector.shape_cast %24 : vector<1x8x128xf32> to vector<8x128xf32>
    %26 = arith.addf %22, %25 : vector<8x128xf32>
    %c8_i32_13 = arith.constant 8 : i32
    %27 = arith.cmpi slt, %20, %c8_i32_13 : i32
    %28 = math.tanh %26 : vector<8x128xf32>
    %29 = arith.select %27, %28, %15 : vector<8x128xf32>
    %30 = arith.index_cast %c1_i32 : i32 to index
    %c0_14 = arith.constant 0 : index
    %c0_15 = arith.constant 0 : index
    %31 = vector.load %arg4[%30, %c0_14, %c0_15] : memref<8x8x128xf32, #tpu.memory_space<vmem>>, vector<1x8x128xf32>
    %32 = vector.shape_cast %31 : vector<1x8x128xf32> to vector<8x128xf32>
    %33 = vector.shape_cast %29 : vector<8x128xf32> to vector<1x8x128xf32>
    tpu.vector_store %arg4[%30, %c0_14, %c0_15], %33 {strides = array<i32>} : memref<8x8x128xf32, #tpu.memory_space<vmem>>, vector<1x8x128xf32>,
    %c2_i32 = arith.constant 2 : i32
    %34 = arith.addi %4, %c2_i32 : i32
    %35 = arith.truncf %29 : vector<8x128xf32> to vector<8x128xbf16>
    %cst_16 = arith.constant dense<0.000000e+00> : vector<8x128xf32>
    %36 = tpu.matmul %35, %3, %cst_16 {dimension_numbers = #tpu.dot_dimension_numbers<[1], [0], [0], [1], [0, 0, 1, 1], [], []>} : vector<8x128xbf16>, vector<128x128xbf16>, vector<8x128xf32> -> vector<8x128xf32>
    %37 = arith.index_cast %c2_i32 : i32 to index
    %c0_17 = arith.constant 0 : index
    %c0_18 = arith.constant 0 : index
    %38 = vector.load %arg1[%37, %c0_17, %c0_18] : memref<8x8x128xf32, #tpu.memory_space<vmem>>, vector<1x8x128xf32>
    %39 = vector.shape_cast %38 : vector<1x8x128xf32> to vector<8x128xf32>
    %40 = arith.addf %36, %39 : vector<8x128xf32>
    %c8_i32_19 = arith.constant 8 : i32
    %41 = arith.cmpi slt, %34, %c8_i32_19 : i32
    %42 = math.tanh %40 : vector<8x128xf32>
    %43 = arith.select %41, %42, %29 : vector<8x128xf32>
    %44 = arith.index_cast %c2_i32 : i32 to index
    %c0_20 = arith.constant 0 : index
    %c0_21 = arith.constant 0 : index
    %45 = vector.load %arg4[%44, %c0_20, %c0_21] : memref<8x8x128xf32, #tpu.memory_space<vmem>>, vector<1x8x128xf32>
    %46 = vector.shape_cast %45 : vector<1x8x128xf32> to vector<8x128xf32>
    %47 = vector.shape_cast %43 : vector<8x128xf32> to vector<1x8x128xf32>
    tpu.vector_store %arg4[%44, %c0_20, %c0_21], %47 {strides = array<i32>} : memref<8x8x128xf32, #tpu.memory_space<vmem>>, vector<1x8x128xf32>,
    %c3_i32 = arith.constant 3 : i32
    %48 = arith.addi %4, %c3_i32 : i32
    %49 = arith.truncf %43 : vector<8x128xf32> to vector<8x128xbf16>
    %cst_22 = arith.constant dense<0.000000e+00> : vector<8x128xf32>
    %50 = tpu.matmul %49, %3, %cst_22 {dimension_numbers = #tpu.dot_dimension_numbers<[1], [0], [0], [1], [0, 0, 1, 1], [], []>} : vector<8x128xbf16>, vector<128x128xbf16>, vector<8x128xf32> -> vector<8x128xf32>
    %51 = arith.index_cast %c3_i32 : i32 to index
    %c0_23 = arith.constant 0 : index
    %c0_24 = arith.constant 0 : index
    %52 = vector.load %arg1[%51, %c0_23, %c0_24] : memref<8x8x128xf32, #tpu.memory_space<vmem>>, vector<1x8x128xf32>
    %53 = vector.shape_cast %52 : vector<1x8x128xf32> to vector<8x128xf32>
    %54 = arith.addf %50, %53 : vector<8x128xf32>
    %c8_i32_25 = arith.constant 8 : i32
    %55 = arith.cmpi slt, %48, %c8_i32_25 : i32
    %56 = math.tanh %54 : vector<8x128xf32>
    %57 = arith.select %55, %56, %43 : vector<8x128xf32>
    %58 = arith.index_cast %c3_i32 : i32 to index
    %c0_26 = arith.constant 0 : index
    %c0_27 = arith.constant 0 : index
    %59 = vector.load %arg4[%58, %c0_26, %c0_27] : memref<8x8x128xf32, #tpu.memory_space<vmem>>, vector<1x8x128xf32>
    %60 = vector.shape_cast %59 : vector<1x8x128xf32> to vector<8x128xf32>
    %61 = vector.shape_cast %57 : vector<8x128xf32> to vector<1x8x128xf32>
    tpu.vector_store %arg4[%58, %c0_26, %c0_27], %61 {strides = array<i32>} : memref<8x8x128xf32, #tpu.memory_space<vmem>>, vector<1x8x128xf32>,
    %c4_i32 = arith.constant 4 : i32
    %62 = arith.addi %4, %c4_i32 : i32
    %63 = arith.truncf %57 : vector<8x128xf32> to vector<8x128xbf16>
    %cst_28 = arith.constant dense<0.000000e+00> : vector<8x128xf32>
    %64 = tpu.matmul %63, %3, %cst_28 {dimension_numbers = #tpu.dot_dimension_numbers<[1], [0], [0], [1], [0, 0, 1, 1], [], []>} : vector<8x128xbf16>, vector<128x128xbf16>, vector<8x128xf32> -> vector<8x128xf32>
    %65 = arith.index_cast %c4_i32 : i32 to index
    %c0_29 = arith.constant 0 : index
    %c0_30 = arith.constant 0 : index
    %66 = vector.load %arg1[%65, %c0_29, %c0_30] : memref<8x8x128xf32, #tpu.memory_space<vmem>>, vector<1x8x128xf32>
    %67 = vector.shape_cast %66 : vector<1x8x128xf32> to vector<8x128xf32>
    %68 = arith.addf %64, %67 : vector<8x128xf32>
    %c8_i32_31 = arith.constant 8 : i32
    %69 = arith.cmpi slt, %62, %c8_i32_31 : i32
    %70 = math.tanh %68 : vector<8x128xf32>
    %71 = arith.select %69, %70, %57 : vector<8x128xf32>
    %72 = arith.index_cast %c4_i32 : i32 to index
    %c0_32 = arith.constant 0 : index
    %c0_33 = arith.constant 0 : index
    %73 = vector.load %arg4[%72, %c0_32, %c0_33] : memref<8x8x128xf32, #tpu.memory_space<vmem>>, vector<1x8x128xf32>
    %74 = vector.shape_cast %73 : vector<1x8x128xf32> to vector<8x128xf32>
    %75 = vector.shape_cast %71 : vector<8x128xf32> to vector<1x8x128xf32>
    tpu.vector_store %arg4[%72, %c0_32, %c0_33], %75 {strides = array<i32>} : memref<8x8x128xf32, #tpu.memory_space<vmem>>, vector<1x8x128xf32>,
    %c5_i32 = arith.constant 5 : i32
    %76 = arith.addi %4, %c5_i32 : i32
    %77 = arith.truncf %71 : vector<8x128xf32> to vector<8x128xbf16>
    %cst_34 = arith.constant dense<0.000000e+00> : vector<8x128xf32>
    %78 = tpu.matmul %77, %3, %cst_34 {dimension_numbers = #tpu.dot_dimension_numbers<[1], [0], [0], [1], [0, 0, 1, 1], [], []>} : vector<8x128xbf16>, vector<128x128xbf16>, vector<8x128xf32> -> vector<8x128xf32>
    %79 = arith.index_cast %c5_i32 : i32 to index
    %c0_35 = arith.constant 0 : index
    %c0_36 = arith.constant 0 : index
    %80 = vector.load %arg1[%79, %c0_35, %c0_36] : memref<8x8x128xf32, #tpu.memory_space<vmem>>, vector<1x8x128xf32>
    %81 = vector.shape_cast %80 : vector<1x8x128xf32> to vector<8x128xf32>
    %82 = arith.addf %78, %81 : vector<8x128xf32>
    %c8_i32_37 = arith.constant 8 : i32
    %83 = arith.cmpi slt, %76, %c8_i32_37 : i32
    %84 = math.tanh %82 : vector<8x128xf32>
    %85 = arith.select %83, %84, %71 : vector<8x128xf32>
    %86 = arith.index_cast %c5_i32 : i32 to index
    %c0_38 = arith.constant 0 : index
    %c0_39 = arith.constant 0 : index
    %87 = vector.load %arg4[%86, %c0_38, %c0_39] : memref<8x8x128xf32, #tpu.memory_space<vmem>>, vector<1x8x128xf32>
    %88 = vector.shape_cast %87 : vector<1x8x128xf32> to vector<8x128xf32>
    %89 = vector.shape_cast %85 : vector<8x128xf32> to vector<1x8x128xf32>
    tpu.vector_store %arg4[%86, %c0_38, %c0_39], %89 {strides = array<i32>} : memref<8x8x128xf32, #tpu.memory_space<vmem>>, vector<1x8x128xf32>,
    %c6_i32 = arith.constant 6 : i32
    %90 = arith.addi %4, %c6_i32 : i32
    %91 = arith.truncf %85 : vector<8x128xf32> to vector<8x128xbf16>
    %cst_40 = arith.constant dense<0.000000e+00> : vector<8x128xf32>
    %92 = tpu.matmul %91, %3, %cst_40 {dimension_numbers = #tpu.dot_dimension_numbers<[1], [0], [0], [1], [0, 0, 1, 1], [], []>} : vector<8x128xbf16>, vector<128x128xbf16>, vector<8x128xf32> -> vector<8x128xf32>
    %93 = arith.index_cast %c6_i32 : i32 to index
    %c0_41 = arith.constant 0 : index
    %c0_42 = arith.constant 0 : index
    %94 = vector.load %arg1[%93, %c0_41, %c0_42] : memref<8x8x128xf32, #tpu.memory_space<vmem>>, vector<1x8x128xf32>
    %95 = vector.shape_cast %94 : vector<1x8x128xf32> to vector<8x128xf32>
    %96 = arith.addf %92, %95 : vector<8x128xf32>
    %c8_i32_43 = arith.constant 8 : i32
    %97 = arith.cmpi slt, %90, %c8_i32_43 : i32
    %98 = math.tanh %96 : vector<8x128xf32>
    %99 = arith.select %97, %98, %85 : vector<8x128xf32>
    %100 = arith.index_cast %c6_i32 : i32 to index
    %c0_44 = arith.constant 0 : index
    %c0_45 = arith.constant 0 : index
    %101 = vector.load %arg4[%100, %c0_44, %c0_45] : memref<8x8x128xf32, #tpu.memory_space<vmem>>, vector<1x8x128xf32>
    %102 = vector.shape_cast %101 : vector<1x8x128xf32> to vector<8x128xf32>
    %103 = vector.shape_cast %99 : vector<8x128xf32> to vector<1x8x128xf32>
    tpu.vector_store %arg4[%100, %c0_44, %c0_45], %103 {strides = array<i32>} : memref<8x8x128xf32, #tpu.memory_space<vmem>>, vector<1x8x128xf32>,
    %c7_i32 = arith.constant 7 : i32
    %104 = arith.addi %4, %c7_i32 : i32
    %105 = arith.truncf %99 : vector<8x128xf32> to vector<8x128xbf16>
    %cst_46 = arith.constant dense<0.000000e+00> : vector<8x128xf32>
    %106 = tpu.matmul %105, %3, %cst_46 {dimension_numbers = #tpu.dot_dimension_numbers<[1], [0], [0], [1], [0, 0, 1, 1], [], []>} : vector<8x128xbf16>, vector<128x128xbf16>, vector<8x128xf32> -> vector<8x128xf32>
    %107 = arith.index_cast %c7_i32 : i32 to index
    %c0_47 = arith.constant 0 : index
    %c0_48 = arith.constant 0 : index
    %108 = vector.load %arg1[%107, %c0_47, %c0_48] : memref<8x8x128xf32, #tpu.memory_space<vmem>>, vector<1x8x128xf32>
    %109 = vector.shape_cast %108 : vector<1x8x128xf32> to vector<8x128xf32>
    %110 = arith.addf %106, %109 : vector<8x128xf32>
    %c8_i32_49 = arith.constant 8 : i32
    %111 = arith.cmpi slt, %104, %c8_i32_49 : i32
    %112 = math.tanh %110 : vector<8x128xf32>
    %113 = arith.select %111, %112, %99 : vector<8x128xf32>
    %114 = arith.index_cast %c7_i32 : i32 to index
    %c0_50 = arith.constant 0 : index
    %c0_51 = arith.constant 0 : index
    %115 = vector.load %arg4[%114, %c0_50, %c0_51] : memref<8x8x128xf32, #tpu.memory_space<vmem>>, vector<1x8x128xf32>
    %116 = vector.shape_cast %115 : vector<1x8x128xf32> to vector<8x128xf32>
    %117 = vector.shape_cast %113 : vector<8x128xf32> to vector<1x8x128xf32>
    tpu.vector_store %arg4[%114, %c0_50, %c0_51], %117 {strides = array<i32>} : memref<8x8x128xf32, #tpu.memory_space<vmem>>, vector<1x8x128xf32>,
    %c8_i32_52 = arith.constant 8 : i32
    %c0_53 = arith.constant 0 : index
    %c0_54 = arith.constant 0 : index
    %118 = vector.load %arg5[%c0_53, %c0_54] : memref<8x128xf32, #tpu.memory_space<vmem>>, vector<8x128xf32>
    tpu.vector_store %arg5[%c0_53, %c0_54], %113 {strides = array<i32>} : memref<8x128xf32, #tpu.memory_space<vmem>>, vector<8x128xf32>,
    return
  }
  func.func @transform_0(%arg0: i32) -> (i32, i32, i32) {
    %c0_i32 = arith.constant 0 : i32
    %c0_i32_0 = arith.constant 0 : i32
    %c0_i32_1 = arith.constant 0 : i32
    return %arg0, %c0_i32, %c0_i32_0 : i32, i32, i32
  }
  func.func @transform_1(%arg0: i32) -> (i32, i32) {
    %c0_i32 = arith.constant 0 : i32
    %c0_i32_0 = arith.constant 0 : i32
    %c0_i32_1 = arith.constant 0 : i32
    return %c0_i32, %c0_i32_0 : i32, i32
  }
  func.func @transform_2(%arg0: i32) -> (i32, i32) {
    %c0_i32 = arith.constant 0 : i32
    %c0_i32_0 = arith.constant 0 : i32
    %c0_i32_1 = arith.constant 0 : i32
    return %c0_i32, %c0_i32_0 : i32, i32
  }
  func.func @transform_3(%arg0: i32) -> (i32, i32, i32) {
    %c0_i32 = arith.constant 0 : i32
    %c0_i32_0 = arith.constant 0 : i32
    %c0_i32_1 = arith.constant 0 : i32
    return %arg0, %c0_i32, %c0_i32_0 : i32, i32, i32
  }
}

</mosaic_0001>

<bundles_post_ra>
// kernel: rnn_forward.1
= control target key start
LH: loop header
LB: loop body
LE: loop exit
PB: predicated region body
PF: predicated region fallthrough
CT: control target
= control target key end

     0   :  { %v785_v0 = vmov 0.0   ;;  %vm786_vm0 = vmmov 0   ;;  %s1042_s1 = inlined_call_operand.vmem [shape: bf16[128,128], index: 1, kind: input, shape index: {}]   ;;  %s1043_s2 = inlined_call_operand.vmem [shape: f32[8,128], index: 2, kind: input, shape index: {}]   ;;  %s1044_s0 = inlined_call_operand.vmem [shape: f32[8,8,128], index: 0, kind: input, shape index: {}]   ;;  %s1045_s3 = inlined_call_operand.vmem [shape: f32[8,8,128], index: 3, kind: output, shape index: {}]  }
   0x1   :  { %599 = vmatprep.subr.bf16.mxu0 %v785_v0  ;;  %v811_v1 = vld [vmem:[%s1042_s1] sm:$0xff]   ;;  %615 = vmatprep.mubr.msk.bf16.mxu0 %vm786_vm0, %v785_v0  ;;  %v822_v2 = vld [vmem:[%s1042_s1 + $0x8] sm:$0xff]   ;;  %v831_v3 = vld [vmem:[%s1042_s1 + $0x10] sm:$0xff]  }
   0x2   :  { %619 = vmatprep.subr.bf16.mxu1 %v785_v0  ;;  %635 = vmatprep.mubr.msk.bf16.mxu1 %vm786_vm0, %v785_v0  ;;  %v840_v4 = vld [vmem:[%s1042_s1 + $0x18] sm:$0xff]   ;;  %v849_v5 = vld [vmem:[%s1042_s1 + $0x20] sm:$0xff]   ;;  %v858_v6 = vld [vmem:[%s1042_s1 + $0x28] sm:$0xff]  }
   0x3   :  { %600 = vmatpush3.bf16.msra.mxu0 %v811_v1  ;;  %620 = vmatpush3.bf16.msra.mxu1 %v811_v1  ;;  %v867_v7 = vld [vmem:[%s1042_s1 + $0x30] sm:$0xff]   ;;  %v876_v8 = vld [vmem:[%s1042_s1 + $0x38] sm:$0xff]   ;;  %v19_v9 = vld [vmem:[%s1043_s2] sm:$0xff] }
   0x4   :  { %601 = vmatprep.subr.bf16.mxu0 %v785_v0  ;;  %621 = vmatprep.subr.bf16.mxu1 %v785_v0  ;;  %v39_v10 = vpack.c.bf16 %v19_v9, %v19_v9  ;;  %v40_v11 = vld [vmem:[%s1044_s0] sm:$0xff]  ;;  %v513_v19 = vld [vmem:[%s1044_s0 + $0x8] sm:$0xff]  ;;  %v515_v27 = vld [vmem:[%s1044_s0 + $0x10] sm:$0xff] }
   0x5   :  { %v517_v35 = vld [vmem:[%s1044_s0 + $0x18] sm:$0xff]  ;;  %v519_v43 = vld [vmem:[%s1044_s0 + $0x20] sm:$0xff]  ;;  %v521_v51 = vld [vmem:[%s1044_s0 + $0x28] sm:$0xff] }
   0x6   :  { %v523_v59 = vld [vmem:[%s1044_s0 + $0x30] sm:$0xff] }
   0x7   :  { %602 = vmatpush3.bf16.msra.mxu0 %v822_v2  ;;  %622 = vmatpush3.bf16.msra.mxu1 %v822_v2 }
   0x8   :  { %603 = vmatprep.subr.bf16.mxu0 %v785_v0  ;;  %623 = vmatprep.subr.bf16.mxu1 %v785_v0 }
   0xb   :  { %604 = vmatpush3.bf16.msra.mxu0 %v831_v3  ;;  %624 = vmatpush3.bf16.msra.mxu1 %v831_v3 }
   0xc   :  { %605 = vmatprep.subr.bf16.mxu0 %v785_v0  ;;  %625 = vmatprep.subr.bf16.mxu1 %v785_v0 }
   0xf   :  { %606 = vmatpush3.bf16.msra.mxu0 %v840_v4  ;;  %626 = vmatpush3.bf16.msra.mxu1 %v840_v4 }
  0x10   :  { %607 = vmatprep.subr.bf16.mxu0 %v785_v0  ;;  %627 = vmatprep.subr.bf16.mxu1 %v785_v0 }
  0x13   :  { %608 = vmatpush3.bf16.msra.mxu0 %v849_v5  ;;  %628 = vmatpush3.bf16.msra.mxu1 %v849_v5 }
  0x14   :  { %609 = vmatprep.subr.bf16.mxu0 %v785_v0  ;;  %629 = vmatprep.subr.bf16.mxu1 %v785_v0 }
  0x17   :  { %610 = vmatpush3.bf16.msra.mxu0 %v858_v6  ;;  %630 = vmatpush3.bf16.msra.mxu1 %v858_v6 }
  0x18   :  { %611 = vmatprep.subr.bf16.mxu0 %v785_v0  ;;  %631 = vmatprep.subr.bf16.mxu1 %v785_v0 }
  0x1b   :  { %612 = vmatpush3.bf16.msra.mxu0 %v867_v7  ;;  %632 = vmatpush3.bf16.msra.mxu1 %v867_v7 }
  0x1c   :  { %613 = vmatprep.subr.bf16.mxu0 %v785_v0  ;;  %633 = vmatprep.subr.bf16.mxu1 %v785_v0 }
  0x1f   :  { %614 = vmatpush3.bf16.msra.mxu0 %v876_v8  ;;  %634 = vmatpush3.bf16.msra.mxu1 %v876_v8 }
  0x20   :  { %639 = vmatprep.subr.bf16.mxu0 %v785_v0  ;;  %659 = vmatprep.subr.bf16.mxu1 %v785_v0 }
  0x22   :  { %616 = vmatmul.mubr.bf16.vlgmr.msra.gmra.mrb[0].mxu0 %v39_v10 }
  0x23   :  { %640 = vmatpush3.bf16.msra.mxu0 %v811_v1  ;;  %655 = vmatprep.mubr.msk.bf16.mxu0 %vm786_vm0, %v785_v0 }
  0x24   :  { %641 = vmatprep.subr.bf16.mxu0 %v785_v0 }
  0x27   :  { %642 = vmatpush3.bf16.msra.mxu0 %v822_v2 }
  0x28   :  { %643 = vmatprep.subr.bf16.mxu0 %v785_v0 }
  0x2b   :  { %644 = vmatpush3.bf16.msra.mxu0 %v831_v3 }
  0x2c   :  { %645 = vmatprep.subr.bf16.mxu0 %v785_v0 }
  0x2f   :  { %646 = vmatpush3.bf16.msra.mxu0 %v840_v4 }
  0x30   :  { %647 = vmatprep.subr.bf16.mxu0 %v785_v0 }
  0x33   :  { %648 = vmatpush3.bf16.msra.mxu0 %v849_v5 }
  0x34   :  { %649 = vmatprep.subr.bf16.mxu0 %v785_v0 }
  0x37   :  { %650 = vmatpush3.bf16.msra.mxu0 %v858_v6 }
  0x38   :  { %651 = vmatprep.subr.bf16.mxu0 %v785_v0 }
  0x3b   :  { %652 = vmatpush3.bf16.msra.mxu0 %v867_v7 }
  0x3c   :  { %653 = vmatprep.subr.bf16.mxu0 %v785_v0 }
  0x3f   :  { %654 = vmatpush3.bf16.msra.mxu0 %v876_v8 }
  0x40   :  { %679 = vmatprep.subr.bf16.mxu0 %v785_v0 }
  0xf5   :  { %v123_v12 = vpop.f32.mrb[0].mxu0 }
  0xf6   :  { %v124_v13 = vadd.f32 %v123_v12, %v40_v11  ;;  %v617_v14 = vpop.f32.mrb[1].mxu0 }
  0xf7   :  { %v126_v15 = vpop.f32.mrb[2].mxu0 }
  0xf8   :  { %769 = vtanh.f32 %v124_v13  ;;  %v618_v16 = vpop.f32.mrb[3].mxu0 }
 0x102   :  { %v770_v17 = vpop.eup %769 }
 0x103   :  { %135 = vst [vmem:[%s1045_s3] sm:$0xff] %v770_v17  ;;  %v137_v18 = vpack.c.bf16 %v770_v17, %v770_v17 }
 0x105   :  { %636 = vmatmul.mubr.bf16.vlgmr.msra.gmra.mrb[0].mxu1 %v137_v18 }
 0x106   :  { %660 = vmatpush3.bf16.msra.mxu1 %v811_v1  ;;  %675 = vmatprep.mubr.msk.bf16.mxu1 %vm786_vm0, %v785_v0 }
 0x107   :  { %661 = vmatprep.subr.bf16.mxu1 %v785_v0 }
 0x10a   :  { %662 = vmatpush3.bf16.msra.mxu1 %v822_v2 }
 0x10b   :  { %663 = vmatprep.subr.bf16.mxu1 %v785_v0 }
 0x10e   :  { %664 = vmatpush3.bf16.msra.mxu1 %v831_v3 }
 0x10f   :  { %665 = vmatprep.subr.bf16.mxu1 %v785_v0 }
 0x112   :  { %666 = vmatpush3.bf16.msra.mxu1 %v840_v4 }
 0x113   :  { %667 = vmatprep.subr.bf16.mxu1 %v785_v0 }
 0x116   :  { %668 = vmatpush3.bf16.msra.mxu1 %v849_v5 }
 0x117   :  { %669 = vmatprep.subr.bf16.mxu1 %v785_v0 }
 0x11a   :  { %670 = vmatpush3.bf16.msra.mxu1 %v858_v6 }
 0x11b   :  { %671 = vmatprep.subr.bf16.mxu1 %v785_v0 }
 0x11e   :  { %672 = vmatpush3.bf16.msra.mxu1 %v867_v7 }
 0x11f   :  { %673 = vmatprep.subr.bf16.mxu1 %v785_v0 }
 0x122   :  { %674 = vmatpush3.bf16.msra.mxu1 %v876_v8 }
 0x123   :  { %699 = vmatprep.subr.bf16.mxu1 %v785_v0 }
 0x1d8   :  { %v174_v20 = vpop.f32.mrb[0].mxu1 }
 0x1d9   :  { %v175_v21 = vadd.f32 %v513_v19, %v174_v20  ;;  %v637_v22 = vpop.f32.mrb[1].mxu1 }
 0x1da   :  { %v177_v23 = vpop.f32.mrb[2].mxu1 }
 0x1db   :  { %771 = vtanh.f32 %v175_v21  ;;  %v638_v24 = vpop.f32.mrb[3].mxu1 }
 0x1e5   :  { %v772_v25 = vpop.eup %771 }
 0x1e6   :  { %514 = vst [vmem:[%s1045_s3 + $0x8] sm:$0xff] %v772_v25  ;;  %v189_v26 = vpack.c.bf16 %v772_v25, %v772_v25 }
 0x1e8   :  { %656 = vmatmul.mubr.bf16.vlgmr.msra.gmra.mrb[4].mxu0 %v189_v26 }
 0x1e9   :  { %680 = vmatpush3.bf16.msra.mxu0 %v811_v1  ;;  %695 = vmatprep.mubr.msk.bf16.mxu0 %vm786_vm0, %v785_v0 }
 0x1ea   :  { %681 = vmatprep.subr.bf16.mxu0 %v785_v0 }
 0x1ed   :  { %682 = vmatpush3.bf16.msra.mxu0 %v822_v2 }
 0x1ee   :  { %683 = vmatprep.subr.bf16.mxu0 %v785_v0 }
 0x1f1   :  { %684 = vmatpush3.bf16.msra.mxu0 %v831_v3 }
 0x1f2   :  { %685 = vmatprep.subr.bf16.mxu0 %v785_v0 }
 0x1f5   :  { %686 = vmatpush3.bf16.msra.mxu0 %v840_v4 }
 0x1f6   :  { %687 = vmatprep.subr.bf16.mxu0 %v785_v0 }
 0x1f9   :  { %688 = vmatpush3.bf16.msra.mxu0 %v849_v5 }
 0x1fa   :  { %689 = vmatprep.subr.bf16.mxu0 %v785_v0 }
 0x1fd   :  { %690 = vmatpush3.bf16.msra.mxu0 %v858_v6 }
 0x1fe   :  { %691 = vmatprep.subr.bf16.mxu0 %v785_v0 }
 0x201   :  { %692 = vmatpush3.bf16.msra.mxu0 %v867_v7 }
 0x202   :  { %693 = vmatprep.subr.bf16.mxu0 %v785_v0 }
 0x205   :  { %694 = vmatpush3.bf16.msra.mxu0 %v876_v8 }
 0x206   :  { %719 = vmatprep.subr.bf16.mxu0 %v785_v0 }
 0x2bb   :  { %v226_v28 = vpop.f32.mrb[4].mxu0 }
 0x2bc   :  { %v227_v29 = vadd.f32 %v515_v27, %v226_v28  ;;  %v657_v30 = vpop.f32.mrb[5].mxu0 }
 0x2bd   :  { %v229_v31 = vpop.f32.mrb[6].mxu0 }
 0x2be   :  { %773 = vtanh.f32 %v227_v29  ;;  %v658_v32 = vpop.f32.mrb[7].mxu0 }
 0x2c8   :  { %v774_v33 = vpop.eup %773 }
 0x2c9   :  { %516 = vst [vmem:[%s1045_s3 + $0x10] sm:$0xff] %v774_v33  ;;  %v241_v34 = vpack.c.bf16 %v774_v33, %v774_v33 }
 0x2cb   :  { %676 = vmatmul.mubr.bf16.vlgmr.msra.gmra.mrb[4].mxu1 %v241_v34 }
 0x2cc   :  { %700 = vmatpush3.bf16.msra.mxu1 %v811_v1  ;;  %715 = vmatprep.mubr.msk.bf16.mxu1 %vm786_vm0, %v785_v0 }
 0x2cd   :  { %701 = vmatprep.subr.bf16.mxu1 %v785_v0 }
 0x2d0   :  { %702 = vmatpush3.bf16.msra.mxu1 %v822_v2 }
 0x2d1   :  { %703 = vmatprep.subr.bf16.mxu1 %v785_v0 }
 0x2d4   :  { %704 = vmatpush3.bf16.msra.mxu1 %v831_v3 }
 0x2d5   :  { %705 = vmatprep.subr.bf16.mxu1 %v785_v0 }
 0x2d8   :  { %706 = vmatpush3.bf16.msra.mxu1 %v840_v4 }
 0x2d9   :  { %707 = vmatprep.subr.bf16.mxu1 %v785_v0 }
 0x2dc   :  { %708 = vmatpush3.bf16.msra.mxu1 %v849_v5 }
 0x2dd   :  { %709 = vmatprep.subr.bf16.mxu1 %v785_v0 }
 0x2e0   :  { %710 = vmatpush3.bf16.msra.mxu1 %v858_v6 }
 0x2e1   :  { %711 = vmatprep.subr.bf16.mxu1 %v785_v0 }
 0x2e4   :  { %712 = vmatpush3.bf16.msra.mxu1 %v867_v7 }
 0x2e5   :  { %713 = vmatprep.subr.bf16.mxu1 %v785_v0 }
 0x2e8   :  { %714 = vmatpush3.bf16.msra.mxu1 %v876_v8 }
 0x2e9   :  { %739 = vmatprep.subr.bf16.mxu1 %v785_v0 }
 0x39e   :  { %v278_v36 = vpop.f32.mrb[4].mxu1 }
 0x39f   :  { %v279_v37 = vadd.f32 %v517_v35, %v278_v36  ;;  %v677_v38 = vpop.f32.mrb[5].mxu1 }
 0x3a0   :  { %v281_v39 = vpop.f32.mrb[6].mxu1 }
 0x3a1   :  { %775 = vtanh.f32 %v279_v37  ;;  %v678_v40 = vpop.f32.mrb[7].mxu1 }
 0x3ab   :  { %v776_v41 = vpop.eup %775 }
 0x3ac   :  { %518 = vst [vmem:[%s1045_s3 + $0x18] sm:$0xff] %v776_v41  ;;  %v293_v42 = vpack.c.bf16 %v776_v41, %v776_v41 }
 0x3ae   :  { %696 = vmatmul.mubr.bf16.vlgmr.msra.gmra.mrb[8].mxu0 %v293_v42 }
 0x3af   :  { %720 = vmatpush3.bf16.msra.mxu0 %v811_v1  ;;  %735 = vmatprep.mubr.msk.bf16.mxu0 %vm786_vm0, %v785_v0 }
 0x3b0   :  { %721 = vmatprep.subr.bf16.mxu0 %v785_v0 }
 0x3b3   :  { %722 = vmatpush3.bf16.msra.mxu0 %v822_v2 }
 0x3b4   :  { %723 = vmatprep.subr.bf16.mxu0 %v785_v0 }
 0x3b7   :  { %724 = vmatpush3.bf16.msra.mxu0 %v831_v3 }
 0x3b8   :  { %725 = vmatprep.subr.bf16.mxu0 %v785_v0 }
 0x3bb   :  { %726 = vmatpush3.bf16.msra.mxu0 %v840_v4 }
 0x3bc   :  { %727 = vmatprep.subr.bf16.mxu0 %v785_v0 }
 0x3bf   :  { %728 = vmatpush3.bf16.msra.mxu0 %v849_v5 }
 0x3c0   :  { %729 = vmatprep.subr.bf16.mxu0 %v785_v0 }
 0x3c3   :  { %730 = vmatpush3.bf16.msra.mxu0 %v858_v6 }
 0x3c4   :  { %731 = vmatprep.subr.bf16.mxu0 %v785_v0 }
 0x3c7   :  { %732 = vmatpush3.bf16.msra.mxu0 %v867_v7 }
 0x3c8   :  { %733 = vmatprep.subr.bf16.mxu0 %v785_v0 }
 0x3cb   :  { %734 = vmatpush3.bf16.msra.mxu0 %v876_v8 }
 0x481   :  { %v330_v44 = vpop.f32.mrb[8].mxu0 }
 0x482   :  { %v331_v45 = vadd.f32 %v519_v43, %v330_v44  ;;  %v697_v46 = vpop.f32.mrb[9].mxu0 }
 0x483   :  { %v333_v47 = vpop.f32.mrb[10].mxu0 }
 0x484   :  { %777 = vtanh.f32 %v331_v45  ;;  %v698_v48 = vpop.f32.mrb[11].mxu0 }
 0x48e   :  { %v778_v49 = vpop.eup %777 }
 0x48f   :  { %520 = vst [vmem:[%s1045_s3 + $0x20] sm:$0xff] %v778_v49  ;;  %v345_v50 = vpack.c.bf16 %v778_v49, %v778_v49 }
 0x491   :  { %716 = vmatmul.mubr.bf16.vlgmr.msra.gmra.mrb[8].mxu1 %v345_v50 }
 0x492   :  { %740 = vmatpush3.bf16.msra.mxu1 %v811_v1  ;;  %755 = vmatprep.mubr.msk.bf16.mxu1 %vm786_vm0, %v785_v0 }
 0x493   :  { %741 = vmatprep.subr.bf16.mxu1 %v785_v0 }
 0x496   :  { %742 = vmatpush3.bf16.msra.mxu1 %v822_v2 }
 0x497   :  { %743 = vmatprep.subr.bf16.mxu1 %v785_v0 }
 0x49a   :  { %744 = vmatpush3.bf16.msra.mxu1 %v831_v3  ;;  %v525_v3 = vld [vmem:[%s1044_s0 + $0x38] sm:$0xff] }
 0x49b   :  { %745 = vmatprep.subr.bf16.mxu1 %v785_v0 }
 0x49e   :  { %746 = vmatpush3.bf16.msra.mxu1 %v840_v4 }
 0x49f   :  { %747 = vmatprep.subr.bf16.mxu1 %v785_v0 }
 0x4a2   :  { %748 = vmatpush3.bf16.msra.mxu1 %v849_v5 }
 0x4a3   :  { %749 = vmatprep.subr.bf16.mxu1 %v785_v0 }
 0x4a6   :  { %750 = vmatpush3.bf16.msra.mxu1 %v858_v6 }
 0x4a7   :  { %751 = vmatprep.subr.bf16.mxu1 %v785_v0 }
 0x4aa   :  { %752 = vmatpush3.bf16.msra.mxu1 %v867_v7 }
 0x4ab   :  { %753 = vmatprep.subr.bf16.mxu1 %v785_v0 }
 0x4ae   :  { %754 = vmatpush3.bf16.msra.mxu1 %v876_v8 }
 0x564   :  { %v382_v52 = vpop.f32.mrb[8].mxu1 }
 0x565   :  { %v383_v53 = vadd.f32 %v521_v51, %v382_v52  ;;  %v717_v54 = vpop.f32.mrb[9].mxu1 }
 0x566   :  { %v385_v55 = vpop.f32.mrb[10].mxu1 }
 0x567   :  { %779 = vtanh.f32 %v383_v53  ;;  %v718_v56 = vpop.f32.mrb[11].mxu1 }
 0x571   :  { %v780_v57 = vpop.eup %779 }
 0x572   :  { %522 = vst [vmem:[%s1045_s3 + $0x28] sm:$0xff] %v780_v57  ;;  %v397_v58 = vpack.c.bf16 %v780_v57, %v780_v57 }
 0x574   :  { %736 = vmatmul.mubr.bf16.vlgmr.msra.gmra.mrb[12].mxu0 %v397_v58 }
 0x647   :  { %v434_v60 = vpop.f32.mrb[12].mxu0 }
 0x648   :  { %v435_v61 = vadd.f32 %v523_v59, %v434_v60  ;;  %v737_v62 = vpop.f32.mrb[13].mxu0 }
 0x649   :  { %v437_v63 = vpop.f32.mrb[14].mxu0 }
 0x64a   :  { %781 = vtanh.f32 %v435_v61  ;;  %v738_v0 = vpop.f32.mrb[15].mxu0 }
 0x654   :  { %v782_v1 = vpop.eup %781 }
 0x655   :  { %524 = vst [vmem:[%s1045_s3 + $0x30] sm:$0xff] %v782_v1  ;;  %v449_v2 = vpack.c.bf16 %v782_v1, %v782_v1 }
 0x657   :  { %756 = vmatmul.mubr.bf16.vlgmr.msra.gmra.mrb[12].mxu1 %v449_v2 }
 0x72a   :  { %v486_v4 = vpop.f32.mrb[12].mxu1 }
 0x72b   :  { %v487_v5 = vadd.f32 %v525_v3, %v486_v4  ;;  %v757_v6 = vpop.f32.mrb[13].mxu1 }
 0x72c   :  { %v489_v7 = vpop.f32.mrb[14].mxu1 }
 0x72d   :  { %783 = vtanh.f32 %v487_v5  ;;  %v758_v8 = vpop.f32.mrb[15].mxu1 }
 0x737   :  { %v784_v9 = vpop.eup %783 }
 0x738   :  { %526 = vst [vmem:[%s1045_s3 + $0x38] sm:$0xff] %v784_v9 }

</bundles_post_ra>
